<compile_context>
chip_gen: v7x
topology: tpu7x:2x2x1
jax: 0.10.0
libtpu: 0.0.40
codegen_flags: <defaults>
</compile_context>

<pallas_src>
import math
from functools import partial

import jax
import jax.numpy as jnp
from jax.experimental import pallas as pl
from jax.experimental.pallas import tpu as pltpu


def _round_up(x, m):
    return ((x + m - 1) // m) * m


def encoder_kernel(x_ref, w1_ref, b1_ref, w2_ref, b2_ref, o_ref):
    # In-kernel bf16 cast of the activation tile (VPU has plenty of slack);
    # both matmuls run on the MXU with f32 accumulation.
    x = x_ref[...].astype(jnp.bfloat16)
    h = jnp.dot(x, w1_ref[...], preferred_element_type=jnp.float32)
    # Bias add + ReLU in f32 on the VPU.
    h = jnp.maximum(h + b1_ref[...], 0.0)
    out = jnp.dot(h.astype(jnp.bfloat16), w2_ref[...],
                  preferred_element_type=jnp.float32)
    o_ref[...] = (out + b2_ref[...]).astype(o_ref.dtype)


def encoder_forward(x, w1, b1, w2, b2, *, latent):
    """Forward pass of the Encoder.

    x:  (B, C, H, W) float32 (flattened to (B, 784) like torch.flatten(x, 1))
    w1: (784, 512)    b1: (512,)
    w2: (512, latent) b2: (latent,)
    Returns (B, latent) float32.
    """
    # torch.flatten(x, start_dim=1)
    x_flat = x.reshape(x.shape[0], -1)
    B, K = x_flat.shape
    H = w1.shape[1]

    # Batch tile: as large as is roofline-friendly, multiple of 8 sublanes.
    TM_MAX = 1024
    TM = min(TM_MAX, _round_up(B, 8))
    # v7x megacore: make sure there are >= 2 grid steps when the batch allows
    # it, so the "parallel" axis can be split across both TensorCores.
    if B > 8 and pl.cdiv(B, TM) < 2:
        TM = max(8, _round_up(pl.cdiv(B, 2), 8))
    grid = (pl.cdiv(B, TM),)

    # Only the (tiny, one-time) weight casts happen in the wrapper; biases stay
    # f32 for the VPU adds.  No activation copies, no padding.
    w1_bf = w1.astype(jnp.bfloat16)                    # (784, 512)
    w2_bf = w2.astype(jnp.bfloat16)                    # (512, latent)
    b1_2d = b1.reshape(1, H).astype(jnp.float32)       # (1, 512)
    b2_2d = b2.reshape(1, latent).astype(jnp.float32)  # (1, latent)

    flops = 2 * B * (K * H + H * latent)
    bytes_accessed = (x_flat.size * 4            # x read (f32, cast in kernel)
                      + w1_bf.size * 2 + w2_bf.size * 2
                      + b1_2d.size * 4 + b2_2d.size * 4
                      + B * latent * 4)          # output write

    out = pl.pallas_call(
        encoder_kernel,
        out_shape=jax.ShapeDtypeStruct((B, latent), jnp.float32),
        grid_spec=pltpu.PrefetchScalarGridSpec(
            num_scalar_prefetch=0,
            grid=grid,
            in_specs=[
                # x: batch-tiled; last dim = full array dim (784) so the
                # non-128-multiple width is legal.
                pl.BlockSpec((TM, K), lambda i: (i, 0)),
                # Weights / biases: constant index_map -> VMEM-resident.
                pl.BlockSpec((K, H), lambda i: (0, 0)),
                pl.BlockSpec((1, H), lambda i: (0, 0)),
                pl.BlockSpec((H, latent), lambda i: (0, 0)),
                pl.BlockSpec((1, latent), lambda i: (0, 0)),
            ],
            out_specs=pl.BlockSpec((TM, latent), lambda i: (i, 0)),
        ),
        compiler_params=pltpu.CompilerParams(
            # Batch rows are independent -> shard grid steps across v7x's 2 TCs.
            dimension_semantics=("parallel",),
            # ~8 MiB actual footprint at TM=1024; 48 MiB leaves headroom on
            # v7x (64 MiB physical) and is safe on v5e/v6e (128 MiB).
            vmem_limit_bytes=48 << 20,
        ),
        cost_estimate=pl.CostEstimate(
            flops=flops, transcendentals=0, bytes_accessed=bytes_accessed),
    )(x_flat, w1_bf, b1_2d, w2_bf, b2_2d)

    return out


def init_params(key, in_dim=784, hidden=512, latent=32):
    """Deterministic init matching nn.Linear's default U(-1/sqrt(fan_in), ...)."""
    k1, k2, k3, k4 = jax.random.split(key, 4)
    bound1 = 1.0 / math.sqrt(in_dim)
    bound2 = 1.0 / math.sqrt(hidden)
    # Stored as (in, out) so the kernel computes x @ W (== torch's x @ W.T).
    w1 = jax.random.uniform(k1, (in_dim, hidden), jnp.float32, -bound1, bound1)
    b1 = jax.random.uniform(k2, (hidden,), jnp.float32, -bound1, bound1)
    w2 = jax.random.uniform(k3, (hidden, latent), jnp.float32, -bound2, bound2)
    b2 = jax.random.uniform(k4, (latent,), jnp.float32, -bound2, bound2)
    return w1, b1, w2, b2


if __name__ == "__main__":
    LATENT_DIMS = 32
    key = jax.random.PRNGKey(0)
    kx, kp = jax.random.split(key)

    # MNIST-like NCHW input (B, 1, 28, 28) so flatten gives 784 features.
    x = jax.random.normal(kx, (2, 1, 28, 28), dtype=jnp.float32)
    w1, b1, w2, b2 = init_params(kp, latent=LATENT_DIMS)

    encoder = jax.jit(partial(encoder_forward, latent=LATENT_DIMS))
    out = encoder(x, w1, b1, w2, b2)
    out = jax.block_until_ready(out)

    # Pure-JAX f32 reference of the same math.
    x_flat = x.reshape(x.shape[0], -1)
    ref = jnp.maximum(x_flat @ w1 + b1[None, :], 0.0) @ w2 + b2[None, :]
    assert out.shape == (2, LATENT_DIMS)
    # bf16 MXU operands -> looser tolerance than a pure-f32 path.
    assert jnp.allclose(out, ref, atol=5e-2, rtol=5e-2), float(
        jnp.max(jnp.abs(out - ref)))

    print("KERNEL_OK")
</pallas_src>

<mosaic_0001>
module attributes {stable_mosaic.version = 11 : i64} {
  func.func @encoder_kernel(%arg0: i32, %arg1: memref<8x784xf32, #tpu.memory_space<vmem>>, %arg2: memref<784x512xbf16, #tpu.memory_space<vmem>>, %arg3: memref<1x512xf32, #tpu.memory_space<vmem>>, %arg4: memref<512x32xbf16, #tpu.memory_space<vmem>>, %arg5: memref<1x32xf32, #tpu.memory_space<vmem>>, %arg6: memref<8x32xf32, #tpu.memory_space<vmem>>) attributes {dimension_semantics = [#tpu.dimension_semantics<parallel>], iteration_bounds = array<i64: 1>, scalar_prefetch = 0 : i64, scratch_operands = 0 : i64, tpu.core_type = #tpu.core_type<tc>, window_params = [{transform_indices = @transform_0, window_bounds = array<i64: 8, 784>}, {pipeline_mode = #tpu.pipeline_mode<synchronous>, transform_indices = @transform_1, window_bounds = array<i64: 784, 512>}, {pipeline_mode = #tpu.pipeline_mode<synchronous>, transform_indices = @transform_2, window_bounds = array<i64: 1, 512>}, {pipeline_mode = #tpu.pipeline_mode<synchronous>, transform_indices = @transform_3, window_bounds = array<i64: 512, 32>}, {pipeline_mode = #tpu.pipeline_mode<synchronous>, transform_indices = @transform_4, window_bounds = array<i64: 1, 32>}, {transform_indices = @transform_5, window_bounds = array<i64: 8, 32>}]} {
    %c0 = arith.constant 0 : index
    %c0_0 = arith.constant 0 : index
    %0 = vector.load %arg1[%c0, %c0_0] : memref<8x784xf32, #tpu.memory_space<vmem>>, vector<8x784xf32>
    %1 = arith.truncf %0 : vector<8x784xf32> to vector<8x784xbf16>
    %c0_1 = arith.constant 0 : index
    %c0_2 = arith.constant 0 : index
    %2 = vector.load %arg2[%c0_1, %c0_2] : memref<784x512xbf16, #tpu.memory_space<vmem>>, vector<784x512xbf16>
    %cst = arith.constant dense<0.000000e+00> : vector<8x512xf32>
    %3 = tpu.matmul %1, %2, %cst {dimension_numbers = #tpu.dot_dimension_numbers<[1], [0], [0], [1], [0, 0, 1, 1], [], []>} : vector<8x784xbf16>, vector<784x512xbf16>, vector<8x512xf32> -> vector<8x512xf32>
    %c0_3 = arith.constant 0 : index
    %c0_4 = arith.constant 0 : index
    %4 = vector.load %arg3[%c0_3, %c0_4] : memref<1x512xf32, #tpu.memory_space<vmem>>, vector<1x512xf32>
    %5 = vector.broadcast %4 : vector<1x512xf32> to vector<8x512xf32>
    %6 = arith.addf %3, %5 : vector<8x512xf32>
    %cst_5 = arith.constant 0.000000e+00 : f32
    %7 = vector.broadcast %cst_5 : f32 to vector<8x512xf32>
    %8 = arith.maximumf %6, %7 : vector<8x512xf32>
    %9 = arith.truncf %8 : vector<8x512xf32> to vector<8x512xbf16>
    %c0_6 = arith.constant 0 : index
    %c0_7 = arith.constant 0 : index
    %10 = vector.load %arg4[%c0_6, %c0_7] : memref<512x32xbf16, #tpu.memory_space<vmem>>, vector<512x32xbf16>
    %cst_8 = arith.constant dense<0.000000e+00> : vector<8x32xf32>
    %11 = tpu.matmul %9, %10, %cst_8 {dimension_numbers = #tpu.dot_dimension_numbers<[1], [0], [0], [1], [0, 0, 1, 1], [], []>} : vector<8x512xbf16>, vector<512x32xbf16>, vector<8x32xf32> -> vector<8x32xf32>
    %c0_9 = arith.constant 0 : index
    %c0_10 = arith.constant 0 : index
    %12 = vector.load %arg5[%c0_9, %c0_10] : memref<1x32xf32, #tpu.memory_space<vmem>>, vector<1x32xf32>
    %13 = vector.broadcast %12 : vector<1x32xf32> to vector<8x32xf32>
    %14 = arith.addf %11, %13 : vector<8x32xf32>
    %c0_11 = arith.constant 0 : index
    %c0_12 = arith.constant 0 : index
    %15 = vector.load %arg6[%c0_11, %c0_12] : memref<8x32xf32, #tpu.memory_space<vmem>>, vector<8x32xf32>
    tpu.vector_store %arg6[%c0_11, %c0_12], %14 {strides = array<i32>} : memref<8x32xf32, #tpu.memory_space<vmem>>, vector<8x32xf32>,
    return
  }
  func.func @transform_0(%arg0: i32) -> (i32, i32) {
    %c0_i32 = arith.constant 0 : i32
    %c0_i32_0 = arith.constant 0 : i32
    return %arg0, %c0_i32 : i32, i32
  }
  func.func @transform_1(%arg0: i32) -> (i32, i32) {
    %c0_i32 = arith.constant 0 : i32
    %c0_i32_0 = arith.constant 0 : i32
    %c0_i32_1 = arith.constant 0 : i32
    return %c0_i32, %c0_i32_0 : i32, i32
  }
  func.func @transform_2(%arg0: i32) -> (i32, i32) {
    %c0_i32 = arith.constant 0 : i32
    %c0_i32_0 = arith.constant 0 : i32
    %c0_i32_1 = arith.constant 0 : i32
    return %c0_i32, %c0_i32_0 : i32, i32
  }
  func.func @transform_3(%arg0: i32) -> (i32, i32) {
    %c0_i32 = arith.constant 0 : i32
    %c0_i32_0 = arith.constant 0 : i32
    %c0_i32_1 = arith.constant 0 : i32
    return %c0_i32, %c0_i32_0 : i32, i32
  }
  func.func @transform_4(%arg0: i32) -> (i32, i32) {
    %c0_i32 = arith.constant 0 : i32
    %c0_i32_0 = arith.constant 0 : i32
    %c0_i32_1 = arith.constant 0 : i32
    return %c0_i32, %c0_i32_0 : i32, i32
  }
  func.func @transform_5(%arg0: i32) -> (i32, i32) {
    %c0_i32 = arith.constant 0 : i32
    %c0_i32_0 = arith.constant 0 : i32
    return %arg0, %c0_i32 : i32, i32
  }
}

</mosaic_0001>

<bundles_post_ra>
// kernel: encoder_forward.1
= control target key start
LH: loop header
LB: loop body
LE: loop exit
PB: predicated region body
PF: predicated region fallthrough
CT: control target
= control target key end

     0   :  { %10 = vsyncpa [#allocation3], 0  ;;  %v2692_v38 = vmov 1983009808   ;;  %v45_v40 = vlaneseq  ;;  %vm1321_vm0 = vcmask 130048   ;;  %vm2004_vm1 = vcmask 261120   ;;  %s3486_s0 = inlined_call_operand.vmem [shape: f32[2,784], index: 0, kind: input, shape index: {}]   ;;  %s3487_s1 = inlined_call_operand.vmem [shape: bf16[784,512], index: 1, kind: input, shape index: {}]   ;;  %s3488_s2 = inlined_call_operand.vmem [shape: f32[1,512], index: 2, kind: input, shape index: {}]   ;;  %s3489_s3 = inlined_call_operand.vmem [shape: bf16[512,32], index: 3, kind: input, shape index: {}]   ;;  %s3490_s4 = inlined_call_operand.vmem [shape: f32[1,32], index: 4, kind: input, shape index: {}]   ;;  %s3491_s5 = inlined_call_operand.hbm [shape: f32[2,32], index: 5, kind: output, shape index: {}]  }
   0x1   :  { %v2330_v0 = vld [vmem:[%s3487_s1 + $0x4] ss:$16 sps:$4 sm:$0xff]   ;;  %v2332_v1 = vld [vmem:[%s3487_s1 + $0xc] ss:$16 sps:$4 sm:$0xff]   ;;  %v2334_v2 = vld [vmem:[%s3487_s1] ss:$16 sps:$4 sm:$0xff]   ;;  %v43_v39 = vunpack.c.l.s4 %v2692_v38 }
   0x2   :  { %v2335_v3 = vld [vmem:[%s3487_s1 + $0x8] ss:$16 sps:$4 sm:$0xff]   ;;  %1325 = vmatprep.subr.bf16.mxu0 %v2330_v0  ;;  %v2336_v4 = vld [vmem:[%s3487_s1 + $0x24] ss:$16 sps:$4 sm:$0xff]   ;;  %1489 = vmatprep.subr.bf16.mxu1 %v2332_v1  ;;  %v2338_v5 = vld [vmem:[%s3487_s1 + $0x2c] ss:$16 sps:$4 sm:$0xff]  }
   0x3   :  { %1326 = vmatpush1.bf16.msra.mxu0 %v2334_v2  ;;  %1490 = vmatpush1.bf16.msra.mxu1 %v2335_v3  ;;  %v2340_v6 = vld [vmem:[%s3487_s1 + $0x20] ss:$16 sps:$4 sm:$0xff]   ;;  %v2341_v7 = vld [vmem:[%s3487_s1 + $0x28] ss:$16 sps:$4 sm:$0xff]   ;;  %v2342_v8 = vld [vmem:[%s3487_s1 + $0x44] ss:$16 sps:$4 sm:$0xff]   ;;  %v44_v45 = vunpack.c.0.s8 %v43_v39 }
   0x4   :  { %1327 = vmatprep.subr.bf16.mxu0 %v2336_v4  ;;  %1491 = vmatprep.subr.bf16.mxu1 %v2338_v5  ;;  %v2344_v9 = vld [vmem:[%s3487_s1 + $0x4c] ss:$16 sps:$4 sm:$0xff]   ;;  %v2346_v10 = vld [vmem:[%s3487_s1 + $0x40] ss:$16 sps:$4 sm:$0xff]   ;;  %v2347_v11 = vld [vmem:[%s3487_s1 + $0x48] ss:$16 sps:$4 sm:$0xff]  }
   0x5   :  { %v2348_v12 = vld [vmem:[%s3487_s1 + $0x64] ss:$16 sps:$4 sm:$0xff]   ;;  %v2350_v13 = vld [vmem:[%s3487_s1 + $0x6c] ss:$16 sps:$4 sm:$0xff]   ;;  %v2352_v14 = vld [vmem:[%s3487_s1 + $0x60] ss:$16 sps:$4 sm:$0xff]  }
   0x6   :  { %v2353_v15 = vld [vmem:[%s3487_s1 + $0x68] ss:$16 sps:$4 sm:$0xff]   ;;  %v2354_v16 = vld [vmem:[%s3487_s1 + $0x84] ss:$16 sps:$4 sm:$0xff]   ;;  %v2356_v17 = vld [vmem:[%s3487_s1 + $0x8c] ss:$16 sps:$4 sm:$0xff]  }
   0x7   :  { %1328 = vmatpush1.bf16.msra.mxu0 %v2340_v6  ;;  %1492 = vmatpush1.bf16.msra.mxu1 %v2341_v7  ;;  %v2358_v18 = vld [vmem:[%s3487_s1 + $0x80] ss:$16 sps:$4 sm:$0xff]   ;;  %v2359_v19 = vld [vmem:[%s3487_s1 + $0x88] ss:$16 sps:$4 sm:$0xff]   ;;  %v2360_v20 = vld [vmem:[%s3487_s1 + $0xa4] ss:$16 sps:$4 sm:$0xff]  }
   0x8   :  { %1329 = vmatprep.subr.bf16.mxu0 %v2342_v8  ;;  %1493 = vmatprep.subr.bf16.mxu1 %v2344_v9  ;;  %v2362_v21 = vld [vmem:[%s3487_s1 + $0xac] ss:$16 sps:$4 sm:$0xff]   ;;  %v2364_v22 = vld [vmem:[%s3487_s1 + $0xa0] ss:$16 sps:$4 sm:$0xff]   ;;  %v2365_v23 = vld [vmem:[%s3487_s1 + $0xa8] ss:$16 sps:$4 sm:$0xff]  }
   0x9   :  { %v2366_v24 = vld [vmem:[%s3487_s1 + $0xc4] ss:$16 sps:$4 sm:$0xff]   ;;  %v2368_v25 = vld [vmem:[%s3487_s1 + $0xcc] ss:$16 sps:$4 sm:$0xff]   ;;  %v2370_v26 = vld [vmem:[%s3487_s1 + $0xc0] ss:$16 sps:$4 sm:$0xff]  }
   0xa   :  { %v2371_v27 = vld [vmem:[%s3487_s1 + $0xc8] ss:$16 sps:$4 sm:$0xff]   ;;  %v2372_v28 = vld [vmem:[%s3487_s1 + $0xe4] ss:$16 sps:$4 sm:$0xff]   ;;  %v2374_v29 = vld [vmem:[%s3487_s1 + $0xec] ss:$16 sps:$4 sm:$0xff]  }
   0xb   :  { %1330 = vmatpush1.bf16.msra.mxu0 %v2346_v10  ;;  %1494 = vmatpush1.bf16.msra.mxu1 %v2347_v11  ;;  %v2376_v30 = vld [vmem:[%s3487_s1 + $0xe0] ss:$16 sps:$4 sm:$0xff]   ;;  %v2377_v31 = vld [vmem:[%s3487_s1 + $0xe8] ss:$16 sps:$4 sm:$0xff]   ;;  %v2378_v32 = vld [vmem:[%s3487_s1 + $0x104] ss:$16 sps:$4 sm:$0xff]  }
   0xc   :  { %1331 = vmatprep.subr.bf16.mxu0 %v2348_v12  ;;  %1495 = vmatprep.subr.bf16.mxu1 %v2350_v13  ;;  %v2380_v33 = vld [vmem:[%s3487_s1 + $0x10c] ss:$16 sps:$4 sm:$0xff]   ;;  %v2382_v34 = vld [vmem:[%s3487_s1 + $0x100] ss:$16 sps:$4 sm:$0xff]   ;;  %v2383_v35 = vld [vmem:[%s3487_s1 + $0x108] ss:$16 sps:$4 sm:$0xff]  }
   0xd   :  { %v2384_v36 = vld [vmem:[%s3487_s1 + $0x124] ss:$16 sps:$4 sm:$0xff]   ;;  %v2386_v37 = vld [vmem:[%s3487_s1 + $0x12c] ss:$16 sps:$4 sm:$0xff]   ;;  %v2388_v41 = vld [vmem:[%s3487_s1 + $0x120] ss:$16 sps:$4 sm:$0xff]  }
   0xe   :  { %v2389_v42 = vld [vmem:[%s3487_s1 + $0x128] ss:$16 sps:$4 sm:$0xff]   ;;  %v2390_v43 = vld [vmem:[%s3487_s1 + $0x144] ss:$16 sps:$4 sm:$0xff]   ;;  %v2392_v44 = vld [vmem:[%s3487_s1 + $0x14c] ss:$16 sps:$4 sm:$0xff]  }
   0xf   :  { %1332 = vmatpush1.bf16.msra.mxu0 %v2352_v14  ;;  %1496 = vmatpush1.bf16.msra.mxu1 %v2353_v15  ;;  %v2853_v46 = vshrl.u32 %v45_v40, 7  ;;  %v2394_v47 = vld [vmem:[%s3487_s1 + $0x140] ss:$16 sps:$4 sm:$0xff]   ;;  %v2395_v48 = vld [vmem:[%s3487_s1 + $0x148] ss:$16 sps:$4 sm:$0xff]  }
  0x10   :  { %1333 = vmatprep.subr.bf16.mxu0 %v2354_v16  ;;  %1497 = vmatprep.subr.bf16.mxu1 %v2356_v17  ;;  %v2396_v49 = vld [vmem:[%s3487_s1 + $0x164] ss:$16 sps:$4 sm:$0xff]   ;;  %v2398_v50 = vld [vmem:[%s3487_s1 + $0x16c] ss:$16 sps:$4 sm:$0xff]   ;;  %v2400_v51 = vld [vmem:[%s3487_s1 + $0x160] ss:$16 sps:$4 sm:$0xff]  }
  0x11   :  { %v2871_v52 = vsub.s32 %v44_v45, %v2853_v46  ;;  %v2401_v53 = vld [vmem:[%s3487_s1 + $0x168] ss:$16 sps:$4 sm:$0xff]   ;;  %v2426_v54 = vld [vmem:[%s3486_s0] ss:$14 sps:$4 sm:$0xff]   ;;  %v2402_v55 = vld [vmem:[%s3487_s1 + $0x184] ss:$16 sps:$4 sm:$0xff]  }
  0x12   :  { %v2429_v56 = vld [vmem:[%s3486_s0 + $0x1c] ss:$14 sps:$4 sm:$0xff]   ;;  %v2406_v60 = vld [vmem:[%s3487_s1 + $0x180] ss:$16 sps:$4 sm:$0xff]   ;;  %v2408_v62 = vld [vmem:[%s3487_s1 + $0x1a4] ss:$16 sps:$4 sm:$0xff]  }
  0x13   :  { %1334 = vmatpush1.bf16.msra.mxu0 %v2358_v18  ;;  %1498 = vmatpush1.bf16.msra.mxu1 %v2359_v19  ;;  %v2404_v57 = vld [vmem:[%s3487_s1 + $0x18c] ss:$16 sps:$4 sm:$0xff]   ;;  %v48_v58 = vrot.slane %v2426_v54, %v2871_v52  ;;  %v62_v59 = vrot.slane %v2429_v56, %v2871_v52  ;;  %v2407_v61 = vld [vmem:[%s3487_s1 + $0x188] ss:$16 sps:$4 sm:$0xff]   ;;  %v2412_v1 = vld [vmem:[%s3487_s1 + $0x1a0] ss:$16 sps:$4 sm:$0xff]  }
  0x14   :  { %1335 = vmatprep.subr.bf16.mxu0 %v2360_v20  ;;  %1499 = vmatprep.subr.bf16.mxu1 %v2362_v21  ;;  %v2410_v0 = vld [vmem:[%s3487_s1 + $0x1ac] ss:$16 sps:$4 sm:$0xff]   ;;  %v2413_v3 = vld [vmem:[%s3487_s1 + $0x1a8] ss:$16 sps:$4 sm:$0xff]   ;;  %v2414_v4 = vld [vmem:[%s3487_s1 + $0x1c4] ss:$16 sps:$4 sm:$0xff]  }
  0x15   :  { %v71_v63 = vcombine.high %v48_v58, %v62_v59  ;;  %v2416_v5 = vld [vmem:[%s3487_s1 + $0x1cc] ss:$16 sps:$4 sm:$0xff]   ;;  %v2428_v6 = vld [vmem:[%s3486_s0 + $0x4] ss:$14 sps:$4 sm:$0xff]   ;;  %v2419_v9 = vld [vmem:[%s3487_s1 + $0x1c8] ss:$16 sps:$4 sm:$0xff]   ;;  %v70_v14 = vcombine.low %v48_v58, %v62_v59 }
  0x16   :  { %v2431_v7 = vld [vmem:[%s3486_s0 + $0x20] ss:$14 sps:$4 sm:$0xff]   ;;  %v2420_v10 = vld [vmem:[%s3487_s1 + $0x1e4] ss:$16 sps:$4 sm:$0xff]   ;;  %v2933_v12 = vrot.slane %v2428_v6, %v2871_v52  ;;  %v2425_v16 = vld [vmem:[%s3487_s1 + $0x1e8] ss:$16 sps:$4 sm:$0xff]  }
  0x17   :  { %1336 = vmatpush1.bf16.msra.mxu0 %v2364_v22  ;;  %1500 = vmatpush1.bf16.msra.mxu1 %v2365_v23  ;;  %v117_v2 = vpack.c.bf16 %v71_v63, %v71_v63  ;;  %v2418_v8 = vld [vmem:[%s3487_s1 + $0x1c0] ss:$16 sps:$4 sm:$0xff]   ;;  %v2422_v11 = vld [vmem:[%s3487_s1 + $0x1ec] ss:$16 sps:$4 sm:$0xff]   ;;  %v2936_v13 = vrot.slane %v2431_v7, %v2871_v52  ;;  %v2434_v17 = vld [vmem:[%s3487_s1 + $0x204] ss:$16 sps:$4 sm:$0xff]   ;;  %v116_v20 = vpack.c.bf16 %v70_v14, %v70_v14 }
  0x18   :  { %1337 = vmatprep.subr.bf16.mxu0 %v2366_v24  ;;  %1501 = vmatprep.subr.bf16.mxu1 %v2368_v25  ;;  %v2424_v15 = vld [vmem:[%s3487_s1 + $0x1e0] ss:$16 sps:$4 sm:$0xff]   ;;  %v2437_v18 = vld [vmem:[%s3487_s1 + $0x20c] ss:$16 sps:$4 sm:$0xff]   ;;  %v2435_v22 = vld [vmem:[%s3487_s1 + $0x208] ss:$16 sps:$4 sm:$0xff]  }
  0x19   :  { %1357 = vmatprep.mubr.bf16.mxu0 %v117_v2  ;;  %1521 = vmatprep.mubr.bf16.mxu1 %v117_v2  ;;  %v73_v19 = vcombine.high %v2933_v12, %v2936_v13  ;;  %v2432_v21 = vld [vmem:[%s3487_s1 + $0x200] ss:$16 sps:$4 sm:$0xff]   ;;  %v2440_v23 = vld [vmem:[%s3487_s1 + $0x224] ss:$16 sps:$4 sm:$0xff]   ;;  %v2443_v24 = vld [vmem:[%s3487_s1 + $0x22c] ss:$16 sps:$4 sm:$0xff]  }
  0x1a   :  { %v2456_v38 = vld [vmem:[%s3487_s1 + $0x280] ss:$16 sps:$4 sm:$0xff]   ;;  %v2459_v39 = vld [vmem:[%s3487_s1 + $0x288] ss:$16 sps:$4 sm:$0xff]   ;;  %v2464_v40 = vld [vmem:[%s3487_s1 + $0x2a4] ss:$16 sps:$4 sm:$0xff]  }
  0x1b   :  { %1338 = vmatpush1.bf16.msra.mxu0 %v2370_v26  ;;  %1502 = vmatpush1.bf16.msra.mxu1 %v2371_v27  ;;  %v119_v25 = vpack.c.bf16 %v73_v19, %v73_v19  ;;  %v2438_v26 = vld [vmem:[%s3487_s1 + $0x220] ss:$16 sps:$4 sm:$0xff]   ;;  %v2441_v27 = vld [vmem:[%s3487_s1 + $0x228] ss:$16 sps:$4 sm:$0xff]   ;;  %v2473_v45 = vld [vmem:[%s3487_s1 + $0x2cc] ss:$16 sps:$4 sm:$0xff]  }
  0x1c   :  { %1339 = vmatprep.subr.bf16.mxu0 %v2372_v28  ;;  %1503 = vmatprep.subr.bf16.mxu1 %v2374_v29  ;;  %v2446_v28 = vld [vmem:[%s3487_s1 + $0x244] ss:$16 sps:$4 sm:$0xff]   ;;  %v2449_v29 = vld [vmem:[%s3487_s1 + $0x24c] ss:$16 sps:$4 sm:$0xff]   ;;  %v2480_v56 = vld [vmem:[%s3487_s1 + $0x300] ss:$16 sps:$4 sm:$0xff]  }
  0x1d   :  { %v2482_v54 = vld [vmem:[%s3487_s1 + $0x304] ss:$16 sps:$4 sm:$0xff]   ;;  %v2491_v59 = vld [vmem:[%s3487_s1 + $0x32c] ss:$16 sps:$4 sm:$0xff]   ;;  %v2510_v14 = vld [vmem:[%s3487_s1 + $0x3a0] ss:$16 sps:$4 sm:$0xff]  }
  0x1e   :  { %v2488_v58 = vld [vmem:[%s3487_s1 + $0x324] ss:$16 sps:$4 sm:$0xff]   ;;  %v2497_v63 = vld [vmem:[%s3487_s1 + $0x34c] ss:$16 sps:$4 sm:$0xff]   ;;  %v2519_v19 = vld [vmem:[%s3487_s1 + $0x3c8] ss:$16 sps:$4 sm:$0xff]  }
  0x1f   :  { %1340 = vmatpush1.bf16.msra.mxu0 %v2376_v30  ;;  %1504 = vmatpush1.bf16.msra.mxu1 %v2377_v31  ;;  %v2444_v30 = vld [vmem:[%s3487_s1 + $0x240] ss:$16 sps:$4 sm:$0xff]   ;;  %v2447_v31 = vld [vmem:[%s3487_s1 + $0x248] ss:$16 sps:$4 sm:$0xff]   ;;  %v2500_v2 = vld [vmem:[%s3487_s1 + $0x364] ss:$16 sps:$4 sm:$0xff]  }
  0x20   :  { %1341 = vmatprep.subr.bf16.mxu0 %v2378_v32  ;;  %1505 = vmatprep.subr.bf16.mxu1 %v2380_v33  ;;  %v2452_v32 = vld [vmem:[%s3487_s1 + $0x264] ss:$16 sps:$4 sm:$0xff]   ;;  %v2455_v33 = vld [vmem:[%s3487_s1 + $0x26c] ss:$16 sps:$4 sm:$0xff]  }
  0x21   :  { %v2506_v6 = vld [vmem:[%s3487_s1 + $0x384] ss:$16 sps:$4 sm:$0xff]   ;;  %v2509_v7 = vld [vmem:[%s3487_s1 + $0x38c] ss:$16 sps:$4 sm:$0xff]  }
  0x23   :  { %1342 = vmatpush1.bf16.msra.mxu0 %v2382_v34  ;;  %1506 = vmatpush1.bf16.msra.mxu1 %v2383_v35  ;;  %v2450_v34 = vld [vmem:[%s3487_s1 + $0x260] ss:$16 sps:$4 sm:$0xff]   ;;  %v2453_v35 = vld [vmem:[%s3487_s1 + $0x268] ss:$16 sps:$4 sm:$0xff]  }
  0x24   :  { %1343 = vmatprep.subr.bf16.mxu0 %v2384_v36  ;;  %1507 = vmatprep.subr.bf16.mxu1 %v2386_v37  ;;  %v2458_v36 = vld [vmem:[%s3487_s1 + $0x284] ss:$16 sps:$4 sm:$0xff]   ;;  %v2461_v37 = vld [vmem:[%s3487_s1 + $0x28c] ss:$16 sps:$4 sm:$0xff]  }
  0x27   :  { %1344 = vmatpush1.bf16.msra.mxu0 %v2388_v41  ;;  %1508 = vmatpush1.bf16.msra.mxu1 %v2389_v42  ;;  %v2467_v41 = vld [vmem:[%s3487_s1 + $0x2ac] ss:$16 sps:$4 sm:$0xff]   ;;  %v2462_v42 = vld [vmem:[%s3487_s1 + $0x2a0] ss:$16 sps:$4 sm:$0xff]  }
  0x28   :  { %1345 = vmatprep.subr.bf16.mxu0 %v2390_v43  ;;  %1509 = vmatprep.subr.bf16.mxu1 %v2392_v44  ;;  %v2465_v43 = vld [vmem:[%s3487_s1 + $0x2a8] ss:$16 sps:$4 sm:$0xff]   ;;  %v2470_v44 = vld [vmem:[%s3487_s1 + $0x2c4] ss:$16 sps:$4 sm:$0xff]  }
  0x2b   :  { %1346 = vmatpush1.bf16.msra.mxu0 %v2394_v47  ;;  %1510 = vmatpush1.bf16.msra.mxu1 %v2395_v48  ;;  %v2468_v47 = vld [vmem:[%s3487_s1 + $0x2c0] ss:$16 sps:$4 sm:$0xff]   ;;  %v2471_v48 = vld [vmem:[%s3487_s1 + $0x2c8] ss:$16 sps:$4 sm:$0xff]  }
  0x2c   :  { %1347 = vmatprep.subr.bf16.mxu0 %v2396_v49  ;;  %1511 = vmatprep.subr.bf16.mxu1 %v2398_v50  ;;  %v2476_v49 = vld [vmem:[%s3487_s1 + $0x2e4] ss:$16 sps:$4 sm:$0xff]   ;;  %v2479_v50 = vld [vmem:[%s3487_s1 + $0x2ec] ss:$16 sps:$4 sm:$0xff]  }
  0x2f   :  { %1348 = vmatpush1.bf16.msra.mxu0 %v2400_v51  ;;  %1512 = vmatpush1.bf16.msra.mxu1 %v2401_v53  ;;  %v2474_v51 = vld [vmem:[%s3487_s1 + $0x2e0] ss:$16 sps:$4 sm:$0xff]   ;;  %v2477_v53 = vld [vmem:[%s3487_s1 + $0x2e8] ss:$16 sps:$4 sm:$0xff]  }
  0x30   :  { %1349 = vmatprep.subr.bf16.mxu0 %v2402_v55  ;;  %1513 = vmatprep.subr.bf16.mxu1 %v2404_v57  ;;  %v2485_v55 = vld [vmem:[%s3487_s1 + $0x30c] ss:$16 sps:$4 sm:$0xff]   ;;  %v2483_v57 = vld [vmem:[%s3487_s1 + $0x308] ss:$16 sps:$4 sm:$0xff]  }
  0x33   :  { %1350 = vmatpush1.bf16.msra.mxu0 %v2406_v60  ;;  %1514 = vmatpush1.bf16.msra.mxu1 %v2407_v61  ;;  %v2486_v60 = vld [vmem:[%s3487_s1 + $0x320] ss:$16 sps:$4 sm:$0xff]   ;;  %v2489_v61 = vld [vmem:[%s3487_s1 + $0x328] ss:$16 sps:$4 sm:$0xff]  }
  0x34   :  { %1351 = vmatprep.subr.bf16.mxu0 %v2408_v62  ;;  %1515 = vmatprep.subr.bf16.mxu1 %v2410_v0  ;;  %v2494_v62 = vld [vmem:[%s3487_s1 + $0x344] ss:$16 sps:$4 sm:$0xff]   ;;  %v2492_v0 = vld [vmem:[%s3487_s1 + $0x340] ss:$16 sps:$4 sm:$0xff]  }
  0x37   :  { %1352 = vmatpush1.bf16.msra.mxu0 %v2412_v1  ;;  %1516 = vmatpush1.bf16.msra.mxu1 %v2413_v3  ;;  %v2495_v1 = vld [vmem:[%s3487_s1 + $0x348] ss:$16 sps:$4 sm:$0xff]   ;;  %v2503_v3 = vld [vmem:[%s3487_s1 + $0x36c] ss:$16 sps:$4 sm:$0xff]  }
  0x38   :  { %1353 = vmatprep.subr.bf16.mxu0 %v2414_v4  ;;  %1517 = vmatprep.subr.bf16.mxu1 %v2416_v5  ;;  %v2498_v4 = vld [vmem:[%s3487_s1 + $0x360] ss:$16 sps:$4 sm:$0xff]   ;;  %v2501_v5 = vld [vmem:[%s3487_s1 + $0x368] ss:$16 sps:$4 sm:$0xff]  }
  0x3b   :  { %1354 = vmatpush1.bf16.msra.mxu0 %v2418_v8  ;;  %1518 = vmatpush1.bf16.msra.mxu1 %v2419_v9  ;;  %v2504_v8 = vld [vmem:[%s3487_s1 + $0x380] ss:$16 sps:$4 sm:$0xff]   ;;  %v2507_v9 = vld [vmem:[%s3487_s1 + $0x388] ss:$16 sps:$4 sm:$0xff]  }
  0x3c   :  { %1355 = vmatprep.subr.bf16.mxu0 %v2420_v10  ;;  %1519 = vmatprep.subr.bf16.mxu1 %v2422_v11  ;;  %v2512_v10 = vld [vmem:[%s3487_s1 + $0x3a4] ss:$16 sps:$4 sm:$0xff]   ;;  %v2515_v11 = vld [vmem:[%s3487_s1 + $0x3ac] ss:$16 sps:$4 sm:$0xff]  }
  0x3f   :  { %1356 = vmatpush1.bf16.msra.mxu0 %v2424_v15  ;;  %1520 = vmatpush1.bf16.msra.mxu1 %v2425_v16  ;;  %v2513_v15 = vld [vmem:[%s3487_s1 + $0x3a8] ss:$16 sps:$4 sm:$0xff]   ;;  %v2518_v16 = vld [vmem:[%s3487_s1 + $0x3c4] ss:$16 sps:$4 sm:$0xff]  }
  0x40   :  { %1366 = vmatprep.subr.bf16.mxu0 %v2434_v17  ;;  %1530 = vmatprep.subr.bf16.mxu1 %v2437_v18  ;;  %v2521_v17 = vld [vmem:[%s3487_s1 + $0x3cc] ss:$16 sps:$4 sm:$0xff]   ;;  %v2516_v18 = vld [vmem:[%s3487_s1 + $0x3c0] ss:$16 sps:$4 sm:$0xff]  }
  0x42   :  { %1358 = vmatmul.mubr.bf16.vlgmr.msra.gmra.mrb[0].mxu0 %v116_v20  ;;  %1522 = vmatmul.mubr.bf16.vlgmr.msra.gmra.mrb[0].mxu1 %v116_v20  ;;  %v2524_v20 = vld [vmem:[%s3487_s1 + $0x3e4] ss:$16 sps:$4 sm:$0xff]  }
  0x43   :  { %1367 = vmatpush1.bf16.msra.mxu0 %v2432_v21  ;;  %1531 = vmatpush1.bf16.msra.mxu1 %v2435_v22  ;;  %v2527_v21 = vld [vmem:[%s3487_s1 + $0x3ec] ss:$16 sps:$4 sm:$0xff]   ;;  %v72_v22 = vcombine.low %v2933_v12, %v2936_v13 }
  0x44   :  { %1368 = vmatprep.subr.bf16.mxu0 %v2440_v23  ;;  %1532 = vmatprep.subr.bf16.mxu1 %v2443_v24  ;;  %v2522_v23 = vld [vmem:[%s3487_s1 + $0x3e0] ss:$16 sps:$4 sm:$0xff]   ;;  %v2525_v24 = vld [vmem:[%s3487_s1 + $0x3e8] ss:$16 sps:$4 sm:$0xff]   ;;  %v2533_v12 = vld [vmem:[%s3487_s1 + $0x40c] ss:$16 sps:$4 sm:$0xff]  }
  0x45   :  { %1398 = vmatprep.mubr.bf16.mxu0 %v119_v25  ;;  %1562 = vmatprep.mubr.bf16.mxu1 %v119_v25  ;;  %v2530_v25 = vld [vmem:[%s3487_s1 + $0x404] ss:$16 sps:$4 sm:$0xff]   ;;  %v118_v13 = vpack.c.bf16 %v72_v22, %v72_v22 }
  0x46   :  { %v2608_v22 = vld [vmem:[%s3487_s1 + $0x5a4] ss:$16 sps:$4 sm:$0xff]  }
  0x47   :  { %1369 = vmatpush1.bf16.msra.mxu0 %v2438_v26  ;;  %1533 = vmatpush1.bf16.msra.mxu1 %v2441_v27  ;;  %v2528_v26 = vld [vmem:[%s3487_s1 + $0x400] ss:$16 sps:$4 sm:$0xff]   ;;  %v2531_v27 = vld [vmem:[%s3487_s1 + $0x408] ss:$16 sps:$4 sm:$0xff]  }
  0x48   :  { %1370 = vmatprep.subr.bf16.mxu0 %v2446_v28  ;;  %1534 = vmatprep.subr.bf16.mxu1 %v2449_v29  ;;  %v2536_v28 = vld [vmem:[%s3487_s1 + $0x424] ss:$16 sps:$4 sm:$0xff]   ;;  %v2534_v29 = vld [vmem:[%s3487_s1 + $0x420] ss:$16 sps:$4 sm:$0xff]  }
  0x4b   :  { %1371 = vmatpush1.bf16.msra.mxu0 %v2444_v30  ;;  %1535 = vmatpush1.bf16.msra.mxu1 %v2447_v31  ;;  %v2539_v30 = vld [vmem:[%s3487_s1 + $0x42c] ss:$16 sps:$4 sm:$0xff]   ;;  %v2624_v31 = vld [vmem:[%s3486_s0 + $0x8] ss:$14 sps:$4 sm:$0xff]  }
  0x4c   :  { %1372 = vmatprep.subr.bf16.mxu0 %v2452_v32  ;;  %1536 = vmatprep.subr.bf16.mxu1 %v2455_v33  ;;  %v2627_v32 = vld [vmem:[%s3486_s0 + $0x24] ss:$14 sps:$4 sm:$0xff]   ;;  %v2537_v33 = vld [vmem:[%s3487_s1 + $0x428] ss:$16 sps:$4 sm:$0xff]  }
  0x4f   :  { %1373 = vmatpush1.bf16.msra.mxu0 %v2450_v34  ;;  %1537 = vmatpush1.bf16.msra.mxu1 %v2453_v35  ;;  %v2542_v34 = vld [vmem:[%s3487_s1 + $0x444] ss:$16 sps:$4 sm:$0xff]   ;;  %v2545_v35 = vld [vmem:[%s3487_s1 + $0x44c] ss:$16 sps:$4 sm:$0xff]  }
  0x50   :  { %1374 = vmatprep.subr.bf16.mxu0 %v2458_v36  ;;  %1538 = vmatprep.subr.bf16.mxu1 %v2461_v37  ;;  %v3177_v36 = vrot.slane %v2624_v31, %v2871_v52  ;;  %v3180_v37 = vrot.slane %v2627_v32, %v2871_v52  ;;  %v2618_v31 = vld [vmem:[%s3487_s1 + $0x5e0] ss:$16 sps:$4 sm:$0xff]   ;;  %v2621_v32 = vld [vmem:[%s3487_s1 + $0x5e8] ss:$16 sps:$4 sm:$0xff]  }
  0x53   :  { %1375 = vmatpush1.bf16.msra.mxu0 %v2456_v38  ;;  %1539 = vmatpush1.bf16.msra.mxu1 %v2459_v39  ;;  %v2540_v38 = vld [vmem:[%s3487_s1 + $0x440] ss:$16 sps:$4 sm:$0xff]   ;;  %v2543_v39 = vld [vmem:[%s3487_s1 + $0x448] ss:$16 sps:$4 sm:$0xff]  }
  0x54   :  { %1376 = vmatprep.subr.bf16.mxu0 %v2464_v40  ;;  %1540 = vmatprep.subr.bf16.mxu1 %v2467_v41  ;;  %v107_v40 = vcombine.high %v3177_v36, %v3180_v37  ;;  %v2548_v41 = vld [vmem:[%s3487_s1 + $0x464] ss:$16 sps:$4 sm:$0xff]  }
  0x57   :  { %1377 = vmatpush1.bf16.msra.mxu0 %v2462_v42  ;;  %1541 = vmatpush1.bf16.msra.mxu1 %v2465_v43  ;;  %v2551_v42 = vld [vmem:[%s3487_s1 + $0x46c] ss:$16 sps:$4 sm:$0xff]   ;;  %v121_v43 = vpack.c.bf16 %v107_v40, %v107_v40  ;;  %v2636_v40 = vld [vmem:[%s3489_s3 + $0x40] sm:$0xff]  }
  0x58   :  { %1378 = vmatprep.subr.bf16.mxu0 %v2470_v44  ;;  %1542 = vmatprep.subr.bf16.mxu1 %v2473_v45  ;;  %v2546_v44 = vld [vmem:[%s3487_s1 + $0x460] ss:$16 sps:$4 sm:$0xff]   ;;  %v2549_v45 = vld [vmem:[%s3487_s1 + $0x468] ss:$16 sps:$4 sm:$0xff]  }
  0x5b   :  { %1379 = vmatpush1.bf16.msra.mxu0 %v2468_v47  ;;  %1543 = vmatpush1.bf16.msra.mxu1 %v2471_v48  ;;  %v2554_v47 = vld [vmem:[%s3487_s1 + $0x484] ss:$16 sps:$4 sm:$0xff]   ;;  %v2557_v48 = vld [vmem:[%s3487_s1 + $0x48c] ss:$16 sps:$4 sm:$0xff]  }
  0x5c   :  { %1380 = vmatprep.subr.bf16.mxu0 %v2476_v49  ;;  %1544 = vmatprep.subr.bf16.mxu1 %v2479_v50  ;;  %v2552_v49 = vld [vmem:[%s3487_s1 + $0x480] ss:$16 sps:$4 sm:$0xff]   ;;  %v2555_v50 = vld [vmem:[%s3487_s1 + $0x488] ss:$16 sps:$4 sm:$0xff]  }
  0x5f   :  { %1381 = vmatpush1.bf16.msra.mxu0 %v2474_v51  ;;  %1545 = vmatpush1.bf16.msra.mxu1 %v2477_v53  ;;  %v2560_v51 = vld [vmem:[%s3487_s1 + $0x4a4] ss:$16 sps:$4 sm:$0xff]   ;;  %v2563_v53 = vld [vmem:[%s3487_s1 + $0x4ac] ss:$16 sps:$4 sm:$0xff]  }
  0x60   :  { %1382 = vmatprep.subr.bf16.mxu0 %v2482_v54  ;;  %1546 = vmatprep.subr.bf16.mxu1 %v2485_v55  ;;  %v2558_v54 = vld [vmem:[%s3487_s1 + $0x4a0] ss:$16 sps:$4 sm:$0xff]   ;;  %v2561_v55 = vld [vmem:[%s3487_s1 + $0x4a8] ss:$16 sps:$4 sm:$0xff]  }
  0x63   :  { %1383 = vmatpush1.bf16.msra.mxu0 %v2480_v56  ;;  %1547 = vmatpush1.bf16.msra.mxu1 %v2483_v57  ;;  %v2566_v56 = vld [vmem:[%s3487_s1 + $0x4c4] ss:$16 sps:$4 sm:$0xff]   ;;  %v2569_v57 = vld [vmem:[%s3487_s1 + $0x4cc] ss:$16 sps:$4 sm:$0xff]  }
  0x64   :  { %1384 = vmatprep.subr.bf16.mxu0 %v2488_v58  ;;  %1548 = vmatprep.subr.bf16.mxu1 %v2491_v59  ;;  %v2564_v58 = vld [vmem:[%s3487_s1 + $0x4c0] ss:$16 sps:$4 sm:$0xff]   ;;  %v2567_v59 = vld [vmem:[%s3487_s1 + $0x4c8] ss:$16 sps:$4 sm:$0xff]  }
  0x67   :  { %1385 = vmatpush1.bf16.msra.mxu0 %v2486_v60  ;;  %1549 = vmatpush1.bf16.msra.mxu1 %v2489_v61  ;;  %v2572_v60 = vld [vmem:[%s3487_s1 + $0x4e4] ss:$16 sps:$4 sm:$0xff]   ;;  %v2575_v61 = vld [vmem:[%s3487_s1 + $0x4ec] ss:$16 sps:$4 sm:$0xff]  }
  0x68   :  { %1386 = vmatprep.subr.bf16.mxu0 %v2494_v62  ;;  %1550 = vmatprep.subr.bf16.mxu1 %v2497_v63  ;;  %v2570_v62 = vld [vmem:[%s3487_s1 + $0x4e0] ss:$16 sps:$4 sm:$0xff]   ;;  %v2573_v63 = vld [vmem:[%s3487_s1 + $0x4e8] ss:$16 sps:$4 sm:$0xff]  }
  0x6b   :  { %1387 = vmatpush1.bf16.msra.mxu0 %v2492_v0  ;;  %1551 = vmatpush1.bf16.msra.mxu1 %v2495_v1  ;;  %v2578_v0 = vld [vmem:[%s3487_s1 + $0x504] ss:$16 sps:$4 sm:$0xff]   ;;  %v2576_v1 = vld [vmem:[%s3487_s1 + $0x500] ss:$16 sps:$4 sm:$0xff]  }
  0x6c   :  { %1388 = vmatprep.subr.bf16.mxu0 %v2500_v2  ;;  %1552 = vmatprep.subr.bf16.mxu1 %v2503_v3  ;;  %v2581_v2 = vld [vmem:[%s3487_s1 + $0x50c] ss:$16 sps:$4 sm:$0xff]   ;;  %v2579_v3 = vld [vmem:[%s3487_s1 + $0x508] ss:$16 sps:$4 sm:$0xff]  }
  0x6f   :  { %1389 = vmatpush1.bf16.msra.mxu0 %v2498_v4  ;;  %1553 = vmatpush1.bf16.msra.mxu1 %v2501_v5  ;;  %v2584_v4 = vld [vmem:[%s3487_s1 + $0x524] ss:$16 sps:$4 sm:$0xff]   ;;  %v2587_v5 = vld [vmem:[%s3487_s1 + $0x52c] ss:$16 sps:$4 sm:$0xff]  }
  0x70   :  { %1390 = vmatprep.subr.bf16.mxu0 %v2506_v6  ;;  %1554 = vmatprep.subr.bf16.mxu1 %v2509_v7  ;;  %v2582_v6 = vld [vmem:[%s3487_s1 + $0x520] ss:$16 sps:$4 sm:$0xff]   ;;  %v2585_v7 = vld [vmem:[%s3487_s1 + $0x528] ss:$16 sps:$4 sm:$0xff]  }
  0x73   :  { %1391 = vmatpush1.bf16.msra.mxu0 %v2504_v8  ;;  %1555 = vmatpush1.bf16.msra.mxu1 %v2507_v9  ;;  %v2590_v8 = vld [vmem:[%s3487_s1 + $0x544] ss:$16 sps:$4 sm:$0xff]   ;;  %v2593_v9 = vld [vmem:[%s3487_s1 + $0x54c] ss:$16 sps:$4 sm:$0xff]  }
  0x74   :  { %1392 = vmatprep.subr.bf16.mxu0 %v2512_v10  ;;  %1556 = vmatprep.subr.bf16.mxu1 %v2515_v11  ;;  %v2588_v10 = vld [vmem:[%s3487_s1 + $0x540] ss:$16 sps:$4 sm:$0xff]   ;;  %v2591_v11 = vld [vmem:[%s3487_s1 + $0x548] ss:$16 sps:$4 sm:$0xff]  }
  0x77   :  { %1393 = vmatpush1.bf16.msra.mxu0 %v2510_v14  ;;  %1557 = vmatpush1.bf16.msra.mxu1 %v2513_v15  ;;  %v2596_v14 = vld [vmem:[%s3487_s1 + $0x564] ss:$16 sps:$4 sm:$0xff]   ;;  %v2599_v15 = vld [vmem:[%s3487_s1 + $0x56c] ss:$16 sps:$4 sm:$0xff]  }
  0x78   :  { %1394 = vmatprep.subr.bf16.mxu0 %v2518_v16  ;;  %1558 = vmatprep.subr.bf16.mxu1 %v2521_v17  ;;  %v2594_v16 = vld [vmem:[%s3487_s1 + $0x560] ss:$16 sps:$4 sm:$0xff]   ;;  %v2597_v17 = vld [vmem:[%s3487_s1 + $0x568] ss:$16 sps:$4 sm:$0xff]  }
  0x7b   :  { %1395 = vmatpush1.bf16.msra.mxu0 %v2516_v18  ;;  %1559 = vmatpush1.bf16.msra.mxu1 %v2519_v19  ;;  %v2602_v18 = vld [vmem:[%s3487_s1 + $0x584] ss:$16 sps:$4 sm:$0xff]   ;;  %v2605_v19 = vld [vmem:[%s3487_s1 + $0x58c] ss:$16 sps:$4 sm:$0xff]  }
  0x7c   :  { %1396 = vmatprep.subr.bf16.mxu0 %v2524_v20  ;;  %1560 = vmatprep.subr.bf16.mxu1 %v2527_v21  ;;  %v2600_v20 = vld [vmem:[%s3487_s1 + $0x580] ss:$16 sps:$4 sm:$0xff]   ;;  %v2603_v21 = vld [vmem:[%s3487_s1 + $0x588] ss:$16 sps:$4 sm:$0xff]  }
  0x7f   :  { %1397 = vmatpush1.bf16.msra.mxu0 %v2522_v23  ;;  %1561 = vmatpush1.bf16.msra.mxu1 %v2525_v24  ;;  %v2611_v23 = vld [vmem:[%s3487_s1 + $0x5ac] ss:$16 sps:$4 sm:$0xff]   ;;  %v2606_v24 = vld [vmem:[%s3487_s1 + $0x5a0] ss:$16 sps:$4 sm:$0xff]  }
  0x80   :  { %1407 = vmatprep.subr.bf16.mxu0 %v2530_v25  ;;  %1571 = vmatprep.subr.bf16.mxu1 %v2533_v12  ;;  %v2609_v25 = vld [vmem:[%s3487_s1 + $0x5a8] ss:$16 sps:$4 sm:$0xff]   ;;  %v2614_v12 = vld [vmem:[%s3487_s1 + $0x5c4] ss:$16 sps:$4 sm:$0xff]  }
  0x82   :  { %1399 = vmatmul.mubr.bf16.vlgmr.msra.gmra.mrb[0].mxu0 %v118_v13  ;;  %1563 = vmatmul.mubr.bf16.vlgmr.msra.gmra.mrb[0].mxu1 %v118_v13  ;;  %v2617_v13 = vld [vmem:[%s3487_s1 + $0x5cc] ss:$16 sps:$4 sm:$0xff]  }
  0x83   :  { %1408 = vmatpush1.bf16.msra.mxu0 %v2528_v26  ;;  %1572 = vmatpush1.bf16.msra.mxu1 %v2531_v27  ;;  %v2612_v26 = vld [vmem:[%s3487_s1 + $0x5c0] ss:$16 sps:$4 sm:$0xff]   ;;  %v2615_v27 = vld [vmem:[%s3487_s1 + $0x5c8] ss:$16 sps:$4 sm:$0xff]  }
  0x84   :  { %1409 = vmatprep.subr.bf16.mxu0 %v2536_v28  ;;  %1573 = vmatprep.subr.bf16.mxu1 %v2539_v30  ;;  %v2620_v28 = vld [vmem:[%s3487_s1 + $0x5e4] ss:$16 sps:$4 sm:$0xff]   ;;  %v106_v30 = vcombine.low %v3177_v36, %v3180_v37 }
  0x85   :  { %1439 = vmatprep.mubr.bf16.mxu0 %v121_v43  ;;  %1603 = vmatprep.mubr.bf16.mxu1 %v121_v43  ;;  %v2629_v36 = vld [vmem:[%s3486_s0 + $0x28] ss:$14 sps:$4 sm:$0x33]   ;;  %v2637_v43 = vld [vmem:[%s3489_s3 + $0xc0] sm:$0xff]  }
  0x86   :  { %v120_v37 = vpack.c.bf16 %v106_v30, %v106_v30 }
  0x87   :  { %1410 = vmatpush1.bf16.msra.mxu0 %v2534_v29  ;;  %1574 = vmatpush1.bf16.msra.mxu1 %v2537_v33  ;;  %v2623_v29 = vld [vmem:[%s3487_s1 + $0x5ec] ss:$16 sps:$4 sm:$0xff]   ;;  %v2632_v33 = vld [vmem:[%s3487_s1 + $0x604] ss:$16 sps:$4 sm:$0xff]  }
  0x88   :  { %1411 = vmatprep.subr.bf16.mxu0 %v2542_v34  ;;  %1575 = vmatprep.subr.bf16.mxu1 %v2545_v35  ;;  %v2635_v34 = vld [vmem:[%s3487_s1 + $0x60c] ss:$16 sps:$4 sm:$0xff]  }
  0x89   :  { %v2626_v35 = vld [vmem:[%s3486_s0 + $0xc] ss:$14 sps:$4 sm:$0x33]  }
  0x8b   :  { %1412 = vmatpush1.bf16.msra.mxu0 %v2540_v38  ;;  %1576 = vmatpush1.bf16.msra.mxu1 %v2543_v39  ;;  %v2630_v38 = vld [vmem:[%s3487_s1 + $0x600] ss:$16 sps:$4 sm:$0xff]   ;;  %v2633_v39 = vld [vmem:[%s3487_s1 + $0x608] ss:$16 sps:$4 sm:$0xff]  }
  0x8c   :  { %1413 = vmatprep.subr.bf16.mxu0 %v2548_v41  ;;  %1577 = vmatprep.subr.bf16.mxu1 %v2551_v42  ;;  %v91_v41 = vrot.slane %v2626_v35, %v2871_v52  ;;  %v105_v42 = vrot.slane %v2629_v36, %v2871_v52  ;;  %v2638_v52 = vld [vmem:[%s3489_s3] sm:$0xff]  }
  0x8f   :  { %1414 = vmatpush1.bf16.msra.mxu0 %v2546_v44  ;;  %1578 = vmatpush1.bf16.msra.mxu1 %v2549_v45  ;;  %v2693_v44 = vmov 0   ;;  %v108_v45 = vcombine.low %v91_v41, %v105_v42 }
  0x90   :  { %1415 = vmatprep.subr.bf16.mxu0 %v2554_v47  ;;  %1579 = vmatprep.subr.bf16.mxu1 %v2557_v48  ;;  %v2639_v48 = vld [vmem:[%s3489_s3 + $0x80] sm:$0xff]  }
  0x91   :  { %v122_v47 = vpack.c.bf16 %v108_v45, %v108_v45 }
  0x93   :  { %1416 = vmatpush1.bf16.msra.mxu0 %v2552_v49  ;;  %1580 = vmatpush1.bf16.msra.mxu1 %v2555_v50  ;;  %v2640_v49 = vld [vmem:[%s3489_s3 + $0x48] sm:$0xff]  }
  0x94   :  { %1417 = vmatprep.subr.bf16.mxu0 %v2560_v51  ;;  %1581 = vmatprep.subr.bf16.mxu1 %v2563_v53  ;;  %v2641_v50 = vld [vmem:[%s3489_s3 + $0xc8] sm:$0xff]  }
  0x95   :  { %v2642_v51 = vld [vmem:[%s3489_s3 + $0x8] sm:$0xff]  }
  0x96   :  { %v2643_v53 = vld [vmem:[%s3489_s3 + $0x88] sm:$0xff]  }
  0x97   :  { %1418 = vmatpush1.bf16.msra.mxu0 %v2558_v54  ;;  %1582 = vmatpush1.bf16.msra.mxu1 %v2561_v55  ;;  %v2644_v54 = vld [vmem:[%s3489_s3 + $0x50] sm:$0xff]  }
  0x98   :  { %1419 = vmatprep.subr.bf16.mxu0 %v2566_v56  ;;  %1583 = vmatprep.subr.bf16.mxu1 %v2569_v57  ;;  %v2645_v55 = vld [vmem:[%s3489_s3 + $0xd0] sm:$0xff]  }
  0x99   :  { %v2646_v56 = vld [vmem:[%s3489_s3 + $0x10] sm:$0xff]  }
  0x9a   :  { %v2647_v57 = vld [vmem:[%s3489_s3 + $0x90] sm:$0xff]  }
  0x9b   :  { %1420 = vmatpush1.bf16.msra.mxu0 %v2564_v58  ;;  %1584 = vmatpush1.bf16.msra.mxu1 %v2567_v59  ;;  %v2648_v58 = vld [vmem:[%s3489_s3 + $0x58] sm:$0xff]  }
  0x9c   :  { %1421 = vmatprep.subr.bf16.mxu0 %v2572_v60  ;;  %1585 = vmatprep.subr.bf16.mxu1 %v2575_v61  ;;  %v2649_v59 = vld [vmem:[%s3489_s3 + $0xd8] sm:$0xff]  }
  0x9d   :  { %v2650_v60 = vld [vmem:[%s3489_s3 + $0x18] sm:$0xff]  }
  0x9e   :  { %v2651_v61 = vld [vmem:[%s3489_s3 + $0x98] sm:$0xff]  }
  0x9f   :  { %1422 = vmatpush1.bf16.msra.mxu0 %v2570_v62  ;;  %1586 = vmatpush1.bf16.msra.mxu1 %v2573_v63  ;;  %v2652_v62 = vld [vmem:[%s3489_s3 + $0x60] sm:$0xff]  }
  0xa0   :  { %1423 = vmatprep.subr.bf16.mxu0 %v2578_v0  ;;  %1587 = vmatprep.subr.bf16.mxu1 %v2581_v2  ;;  %v2653_v63 = vld [vmem:[%s3489_s3 + $0xe0] sm:$0xff]   ;;  %v2656_v2 = vld [vmem:[%s3489_s3 + $0x68] sm:$0xff]  }
  0xa1   :  { %v2654_v0 = vld [vmem:[%s3489_s3 + $0x20] sm:$0xff]  }
  0xa3   :  { %1424 = vmatpush1.bf16.msra.mxu0 %v2576_v1  ;;  %1588 = vmatpush1.bf16.msra.mxu1 %v2579_v3  ;;  %v2655_v1 = vld [vmem:[%s3489_s3 + $0xa0] sm:$0xff]   ;;  %v2657_v3 = vld [vmem:[%s3489_s3 + $0xe8] sm:$0xff]  }
  0xa4   :  { %1425 = vmatprep.subr.bf16.mxu0 %v2584_v4  ;;  %1589 = vmatprep.subr.bf16.mxu1 %v2587_v5  ;;  %v2658_v4 = vld [vmem:[%s3489_s3 + $0x28] sm:$0xff]  }
  0xa5   :  { %v2659_v5 = vld [vmem:[%s3489_s3 + $0xa8] sm:$0xff]  }
  0xa7   :  { %1426 = vmatpush1.bf16.msra.mxu0 %v2582_v6  ;;  %1590 = vmatpush1.bf16.msra.mxu1 %v2585_v7  ;;  %v2660_v6 = vld [vmem:[%s3489_s3 + $0x70] sm:$0xff]  }
  0xa8   :  { %1427 = vmatprep.subr.bf16.mxu0 %v2590_v8  ;;  %1591 = vmatprep.subr.bf16.mxu1 %v2593_v9  ;;  %v2661_v7 = vld [vmem:[%s3489_s3 + $0xf0] sm:$0xff]  }
  0xa9   :  { %v2662_v8 = vld [vmem:[%s3489_s3 + $0x30] sm:$0xff]  }
  0xaa   :  { %v2663_v9 = vld [vmem:[%s3489_s3 + $0xb0] sm:$0xff]  }
  0xab   :  { %1428 = vmatpush1.bf16.msra.mxu0 %v2588_v10  ;;  %1592 = vmatpush1.bf16.msra.mxu1 %v2591_v11  ;;  %v2664_v10 = vld [vmem:[%s3489_s3 + $0x78] sm:$0xff]  }
  0xac   :  { %1429 = vmatprep.subr.bf16.mxu0 %v2596_v14  ;;  %1593 = vmatprep.subr.bf16.mxu1 %v2599_v15  ;;  %v2665_v11 = vld [vmem:[%s3489_s3 + $0xf8] sm:$0xff]  }
  0xad   :  { %v2666_v14 = vld [vmem:[%s3489_s3 + $0x38] sm:$0xff]  }
  0xae   :  { %v2667_v15 = vld [vmem:[%s3489_s3 + $0xb8] sm:$0xff]  }
  0xaf   :  { %1430 = vmatpush1.bf16.msra.mxu0 %v2594_v16  ;;  %1594 = vmatpush1.bf16.msra.mxu1 %v2597_v17  ;;  %v323_v16 = vsub.s32 0, %v2853_v46  ;;  %v319_v17 = vld [vmem:[%s3488_s2] sm:$0xf] }
  0xb0   :  { %1431 = vmatprep.subr.bf16.mxu0 %v2602_v18  ;;  %1595 = vmatprep.subr.bf16.mxu1 %v2605_v19  ;;  %v331_v18 = vsub.s32 2, %v2853_v46  ;;  %v327_v19 = vsub.s32 1, %v2853_v46 }
  0xb3   :  { %1432 = vmatpush1.bf16.msra.mxu0 %v2600_v20  ;;  %1596 = vmatpush1.bf16.msra.mxu1 %v2603_v21  ;;  %v335_v20 = vsub.s32 3, %v2853_v46  ;;  %v324_v21 = vrot.slane %v319_v17, %v323_v16 }
  0xb4   :  { %1433 = vmatprep.subr.bf16.mxu0 %v2608_v22  ;;  %1597 = vmatprep.subr.bf16.mxu1 %v2611_v23  ;;  %v332_v22 = vrot.slane %v319_v17, %v331_v18  ;;  %v328_v23 = vrot.slane %v319_v17, %v327_v19 }
  0xb7   :  { %1434 = vmatpush1.bf16.msra.mxu0 %v2606_v24  ;;  %1598 = vmatpush1.bf16.msra.mxu1 %v2609_v25  ;;  %v336_v24 = vrot.slane %v319_v17, %v335_v20 }
  0xb8   :  { %1435 = vmatprep.subr.bf16.mxu0 %v2614_v12  ;;  %1599 = vmatprep.subr.bf16.mxu1 %v2617_v13 }
  0xbb   :  { %1436 = vmatpush1.bf16.msra.mxu0 %v2612_v26  ;;  %1600 = vmatpush1.bf16.msra.mxu1 %v2615_v27 }
  0xbc   :  { %1437 = vmatprep.subr.bf16.mxu0 %v2620_v28  ;;  %1601 = vmatprep.subr.bf16.mxu1 %v2623_v29 }
  0xbf   :  { %1438 = vmatpush1.bf16.msra.mxu0 %v2618_v31  ;;  %1602 = vmatpush1.bf16.msra.mxu1 %v2621_v32 }
  0xc0   :  { %1448 = vmatprep.subr.bf16.mxu0 %v2632_v33  ;;  %1612 = vmatprep.subr.bf16.mxu1 %v2635_v34 }
  0xc2   :  { %1440 = vmatmul.mubr.bf16.vlgmr.msra.gmra.mrb[0].mxu0 %v120_v37  ;;  %1604 = vmatmul.mubr.bf16.vlgmr.msra.gmra.mrb[0].mxu1 %v120_v37 }
  0xc3   :  { %1449 = vmatpush1.bf16.msra.mxu0 %v2630_v38  ;;  %1613 = vmatpush1.bf16.msra.mxu1 %v2633_v39 }
  0xc4   :  { %1480 = vmatprep.mubr.bf16.mxu0 %v2693_v44  ;;  %1644 = vmatprep.mubr.bf16.mxu1 %v2693_v44  ;;  %v2220_v44 = vld [vmem:[%s3490_s4] ss:$0 sm:$0xff] }
  0xc5   :  { %2253 = vmatprep.subr.bf16.mxu0 %v2636_v40  ;;  %2275 = vmatprep.subr.bf16.mxu1 %v2637_v43 }
  0xce   :  { %2218 = vmatmul.mubr.msk.bf16.vlgmr.msra.gmra.mrb[0].mxu0 %vm1321_vm0, %v122_v47  ;;  %2219 = vmatmul.mubr.msk.bf16.vlgmr.msra.gmra.mrb[0].mxu1 %vm1321_vm0, %v122_v47 }
  0xcf   :  { %2254 = vmatpush3.bf16.msra.mxu0 %v2638_v52  ;;  %2276 = vmatpush3.bf16.msra.mxu1 %v2639_v48 }
  0xd0   :  { %2255 = vmatprep.subr.bf16.mxu0 %v2640_v49  ;;  %2277 = vmatprep.subr.bf16.mxu1 %v2641_v50 }
  0xd3   :  { %2256 = vmatpush3.bf16.msra.mxu0 %v2642_v51  ;;  %2278 = vmatpush3.bf16.msra.mxu1 %v2643_v53 }
  0xd4   :  { %2257 = vmatprep.subr.bf16.mxu0 %v2644_v54  ;;  %2279 = vmatprep.subr.bf16.mxu1 %v2645_v55 }
  0xd7   :  { %2258 = vmatpush3.bf16.msra.mxu0 %v2646_v56  ;;  %2280 = vmatpush3.bf16.msra.mxu1 %v2647_v57 }
  0xd8   :  { %2259 = vmatprep.subr.bf16.mxu0 %v2648_v58  ;;  %2281 = vmatprep.subr.bf16.mxu1 %v2649_v59 }
  0xdb   :  { %2260 = vmatpush3.bf16.msra.mxu0 %v2650_v60  ;;  %2282 = vmatpush3.bf16.msra.mxu1 %v2651_v61 }
  0xdc   :  { %2261 = vmatprep.subr.bf16.mxu0 %v2652_v62  ;;  %2283 = vmatprep.subr.bf16.mxu1 %v2653_v63 }
  0xdf   :  { %2262 = vmatpush3.bf16.msra.mxu0 %v2654_v0  ;;  %2284 = vmatpush3.bf16.msra.mxu1 %v2655_v1 }
  0xe0   :  { %2263 = vmatprep.subr.bf16.mxu0 %v2656_v2  ;;  %2285 = vmatprep.subr.bf16.mxu1 %v2657_v3 }
  0xe3   :  { %2264 = vmatpush3.bf16.msra.mxu0 %v2658_v4  ;;  %2286 = vmatpush3.bf16.msra.mxu1 %v2659_v5 }
  0xe4   :  { %2265 = vmatprep.subr.bf16.mxu0 %v2660_v6  ;;  %2287 = vmatprep.subr.bf16.mxu1 %v2661_v7 }
  0xe7   :  { %2266 = vmatpush3.bf16.msra.mxu0 %v2662_v8  ;;  %2288 = vmatpush3.bf16.msra.mxu1 %v2663_v9 }
  0xe8   :  { %2267 = vmatprep.subr.bf16.mxu0 %v2664_v10  ;;  %2289 = vmatprep.subr.bf16.mxu1 %v2665_v11 }
  0xeb   :  { %2268 = vmatpush3.bf16.msra.mxu0 %v2666_v14  ;;  %2290 = vmatpush3.bf16.msra.mxu1 %v2667_v15 }
 0x1a1   :  { %v1482_v25 = vpop.f32.mrb[0].mxu0  ;;  %v1646_v13 = vpop.f32.mrb[0].mxu1 }
 0x1a2   :  { %v2297_v12 = vadd.f32 %v1482_v25, %v324_v21  ;;  %v1484_v26 = vpop.f32.mrb[1].mxu0  ;;  %v2299_v27 = vadd.f32 %v1646_v13, %v332_v22  ;;  %v1648_v29 = vpop.f32.mrb[1].mxu1 }
 0x1a3   :  { %v2298_v28 = vadd.f32 %v1484_v26, %v328_v23  ;;  %v1486_v30 = vpop.f32.mrb[2].mxu0  ;;  %v2300_v32 = vadd.f32 %v1648_v29, %v336_v24  ;;  %v1650_v33 = vpop.f32.mrb[2].mxu1 }
 0x1a4   :  { %v1653_v31 = vmax.f32 %v2297_v12, 0.0  ;;  %v1487_v34 = vpop.f32.mrb[3].mxu0  ;;  %v1655_v35 = vmax.f32 %v2299_v27, 0.0  ;;  %v1651_v37 = vpop.f32.mrb[3].mxu1 }
 0x1a5   :  { %v1654_v36 = vmax.f32 %v2298_v28, 0.0  ;;  %v1656_v46 = vmax.f32 %v2300_v32, 0.0 }
 0x1a6   :  { %v1657_v39 = vpack.c.bf16 %v1653_v31, %v1653_v31  ;;  %v1659_v41 = vpack.c.bf16 %v1655_v35, %v1655_v35 }
 0x1a7   :  { %v1658_v38 = vpack.c.bf16 %v1654_v36, %v1654_v36  ;;  %v1660_v40 = vpack.c.bf16 %v1656_v46, %v1656_v46 }
 0x1a9   :  { %1956 = vmatprep.mubr.bf16.mxu0 %v1658_v38  ;;  %1996 = vmatprep.mubr.bf16.mxu1 %v1660_v40 }
 0x1aa   :  { %1957 = vmatmul.mubr.bf16.vlgmr.msra.gmra.mrb[4].mxu0 %v1657_v39  ;;  %1997 = vmatmul.mubr.bf16.vlgmr.msra.gmra.mrb[4].mxu1 %v1659_v41 }
 0x27d   :  { %v2269_v42 = vpop.f32.mrb[4].mxu0  ;;  %v2291_v43 = vpop.f32.mrb[4].mxu1 }
 0x27e   :  { %v2270_v45 = vpop.f32.mrb[5].mxu0  ;;  %v2292_v52 = vpop.f32.mrb[5].mxu1 }
 0x27f   :  { %v2271_v47 = vadd.f32 %v2270_v45, %v2269_v42  ;;  %v2272_v48 = vpop.f32.mrb[6].mxu0  ;;  %v2293_v49 = vadd.f32 %v2292_v52, %v2291_v43  ;;  %v2294_v50 = vpop.f32.mrb[6].mxu1 }
 0x280   :  { %v2273_v51 = vpop.f32.mrb[7].mxu0  ;;  %v2295_v54 = vpop.f32.mrb[7].mxu1 }
 0x281   :  { %v1959_v53 = vadd.f32 %v2271_v47, %v2220_v44 }
 0x283   :  { %v1999_v55 = vadd.f32 %v2293_v49, %v1959_v53 }
 0x285   :  { %2005 = vst.msk [vmem:[#allocation2] sm:$0xff] %vm2004_vm1, %v1999_v55 }
 0x286   :  { %2010 = vsyncadd [#allocation3], 96  ;;  %s2694_s11 = smov [#allocation2]  }
 0x287   :  { %s2011_s12 = sshll.u32 %s2694_s11, 4  ;;  %s2012_s12 = int_to_ptr.vmem [resolvable:$true] %s2011_s12 }
 0x288   :  { %s2668_s13 = scalar_lea.vmem %s2012_s12, 32  ;;  %s2672_s14 = scalar_lea.vmem %s2012_s12, 128 }
 0x289   :  { %p2669_p0 = scmp.ne.s32.totalorder %s2012_s12, %s2668_s13  ;;  %p2673_p1 = scmp.lt.s32.totalorder %s2012_s12, %s2012_s12 }
 0x28a   :  { %p2674_p2 = scmp.lt.s32.totalorder %s2672_s14, %s2668_s13 }
 0x28c   :  { %p2675_p3 = por %p2674_p2, %p2673_p1 }
 0x28e   :  { %p2676_p4 = pnand %p2675_p3, %p2669_p0 }
 0x290   :  { %2679 = shalt.err (!%p2676_p4)
}
 0x291   :  { %s2680_s16 = scalar_lea.hbm %s3491_s5, 32 }
 0x292   :  { %p2681_p5 = scmp.ne.s32.totalorder %s3491_s5, %s2680_s16  ;;  %p2684_p6 = scmp.lt.u32.totalorder %s2680_s16, %s3491_s5 }
 0x294   :  { %p2686_p7 = pnand %p2684_p6, %p2681_p5 }
 0x296   :  { %2689 = shalt.err (!%p2686_p7)
}
 0x297   :  { %s2695_s21 = smov 32   ;;  %s2696_s22 = smov 2  }
 0x298   :  { %2017 = dma.vmem_to_hbm [thread:$0]  %s2012_s12, 32, %s3491_s5, [#allocation3], %s2695_s21, %s2695_s21, %s2696_s22  }
 0x299   :  { %2690 = dma.done.wait [#allocation3], 128  }
 0x29a   :  { %2691 = vsyncadd [#allocation3], 4294967168 }
 0x29b   :  { %2021 = vsyncpa [#allocation3], 1 }

</bundles_post_ra>
